<compile_context>
chip_gen: v7x
topology: tpu7x:2x2x1
jax: 0.10.0
libtpu: 0.0.40
codegen_flags: <defaults>
</compile_context>

<pallas_src>
import jax
import jax.numpy as jnp
from jax.experimental import pallas as pl
from jax.experimental.pallas import tpu as pltpu

LANE = 128


def _round_up(x, m):
    return (x + m - 1) // m * m


def variation_kernel(x_ref, w1_ref, w2_ref, wh_ref, vecs_ref, noise_ref, out_ref):
    # x_ref: [B, IN_P]   w1: [IN_P, ZP]   w2: [ZP, ZP]   wh: [ZP, 2*ZP]
    # vecs rows: 0=b1, 1=g1, 2=be1, 3=b2, 4=g2, 5=be2, 6=b_mu, 7=b_ls  (each [ZP])
    # noise: [B, ZP]     out: [B, 3*ZP] = z | mu | logsigma (lane groups of ZP)
    zp = w2_ref.shape[1]
    x = x_ref[...]
    vecs = vecs_ref[...]
    inv_n = 1.0 / x.shape[0]

    def batchnorm(h, g, be):
        # single-pass stats: both reductions independent; var = E[h^2] - mean^2,
        # clamped >= 0 to avoid NaN from f32 cancellation (one extra VPU op).
        mean = jnp.sum(h, axis=0, keepdims=True) * inv_n
        ex2 = jnp.sum(h * h, axis=0, keepdims=True) * inv_n
        var = jnp.maximum(ex2 - mean * mean, 0.0)        # biased variance (training-mode BN)
        return (h - mean) * jax.lax.rsqrt(var + 1e-5) * g + be

    # fc block 1: Linear -> BatchNorm1d -> Tanh
    h = jnp.dot(x, w1_ref[...], preferred_element_type=jnp.float32) + vecs[0:1, :]
    h = jnp.tanh(batchnorm(h, vecs[1:2, :], vecs[2:3, :]))

    # fc block 2: Linear -> BatchNorm1d -> Tanh
    h = jnp.dot(h, w2_ref[...], preferred_element_type=jnp.float32) + vecs[3:4, :]
    h = jnp.tanh(batchnorm(h, vecs[4:5, :], vecs[5:6, :]))

    # fused heads: one [B, ZP] @ [ZP, 2*ZP] matmul; split is at lane 128 -> vreg-aligned
    heads = jnp.dot(h, wh_ref[...], preferred_element_type=jnp.float32)
    mu = heads[:, :zp] + vecs[6:7, :]
    logsigma = heads[:, zp:] + vecs[7:8, :]

    # reparameterization: z = noise * exp(0.5 * logsigma) + mu
    std = jnp.exp(0.5 * logsigma)
    zlat = noise_ref[...] * std + mu

    # direct lane-slice stores at 128-lane boundaries (no concat / lane shuffles)
    out_ref[:, :zp] = zlat
    out_ref[:, zp:2 * zp] = mu
    out_ref[:, 2 * zp:] = logsigma

    # TODO(synk): PyTorch BatchNorm1d (training) also updates running_mean/running_var
    # (unbiased var, momentum=0.1); only the normalization itself is reproduced here.


def _pad_last(x, target):
    pad = target - x.shape[-1]
    if pad == 0:
        return x
    widths = [(0, 0)] * (x.ndim - 1) + [(0, pad)]
    return jnp.pad(x, widths)


def variation_forward(context, params, noise):
    """context: [B, input_size] or [N, B, input_size] f32 (N independent invocations
    amortized into one launch); noise: matching [..., z_size] f32 (N(0,1)).
    Returns (z, mu, logsigma), each [..., z_size]."""
    squeeze = context.ndim == 2
    if squeeze:
        context = context[None]
        noise = noise[None]

    n_inst, batch, _ = context.shape
    z_size = params["z_size"]
    in_p = params["w1"].shape[0]
    zp = params["w2"].shape[1]

    ctx_p = _pad_last(context, in_p)
    noise_p = _pad_last(noise, zp)

    packed = pl.pallas_call(
        variation_kernel,
        out_shape=jax.ShapeDtypeStruct((n_inst, batch, 3 * zp), jnp.float32),
        grid=(n_inst,),
        in_specs=[
            pl.BlockSpec((None, batch, in_p), lambda n: (n, 0, 0)),     # context
            pl.BlockSpec((in_p, zp), lambda n: (0, 0)),                 # w1 (resident)
            pl.BlockSpec((zp, zp), lambda n: (0, 0)),                   # w2 (resident)
            pl.BlockSpec((zp, 2 * zp), lambda n: (0, 0)),               # fused heads
            pl.BlockSpec((8, zp), lambda n: (0, 0)),                    # packed bias/BN vecs
            pl.BlockSpec((None, batch, zp), lambda n: (n, 0, 0)),       # noise
        ],
        out_specs=pl.BlockSpec((None, batch, 3 * zp), lambda n: (n, 0, 0)),
        compiler_params=pltpu.CompilerParams(
            dimension_semantics=("parallel",),      # independent instances -> megacore / 2nd TC
            vmem_limit_bytes=32 * 1024 * 1024,      # explicit, safe on v5e/v6e/v7x
        ),
    )(ctx_p, params["w1"], params["w2"], params["w_heads"], params["vecs"], noise_p)

    # wrapper-side slicing of the padded packed slab (layout plumbing, not compute)
    z = packed[..., :z_size]
    mu = packed[..., zp:zp + z_size]
    logsigma = packed[..., 2 * zp:2 * zp + z_size]
    if squeeze:
        z, mu, logsigma = z[0], mu[0], logsigma[0]
    return z, mu, logsigma


def init_params(key, input_size, z_size):
    """Deterministic init mirroring Variation.init_weights:
    Linear weights ~ U(-0.02, 0.02), biases = 0, BatchNorm gamma=1, beta=0.
    Weights pre-transposed to [in, out], zero-padded to 128-lane multiples,
    heads fused (mu lanes [0,ZP), logsigma lanes [ZP,2*ZP)), and the 8 tiny
    per-feature vectors packed into one [8, ZP] slab."""
    in_p = _round_up(input_size, LANE)
    zp = _round_up(z_size, LANE)
    ks = jax.random.split(key, 4)

    def lin_w(k, fan_in, fan_out, fan_in_p, fan_out_p):
        w = jax.random.uniform(k, (fan_in, fan_out), jnp.float32, -0.02, 0.02)
        return jnp.zeros((fan_in_p, fan_out_p), jnp.float32).at[:fan_in, :fan_out].set(w)

    w1 = lin_w(ks[0], input_size, z_size, in_p, zp)
    w2 = lin_w(ks[1], z_size, z_size, zp, zp)
    w_mu = lin_w(ks[2], z_size, z_size, zp, zp)
    w_ls = lin_w(ks[3], z_size, z_size, zp, zp)
    w_heads = jnp.concatenate([w_mu, w_ls], axis=1)   # [ZP, 2*ZP], each head 128-aligned

    zeros = jnp.zeros((zp,), jnp.float32)
    ones = jnp.ones((zp,), jnp.float32)
    # rows: b1, g1, be1, b2, g2, be2, b_mu, b_ls
    vecs = jnp.stack([zeros, ones, zeros, zeros, ones, zeros, zeros, zeros], axis=0)

    return dict(w1=w1, w2=w2, w_heads=w_heads, vecs=vecs,
                input_size=input_size, z_size=z_size)


if __name__ == "__main__":
    key = jax.random.PRNGKey(0)
    k_param, k_x, k_eps = jax.random.split(key, 3)

    batch_size = 8          # multiple of 8 (f32 sublane group)
    input_size = 32
    z_size = 32
    n_stack = 4             # independent Variation invocations amortized into one launch

    params = init_params(k_param, input_size, z_size)
    context = jax.random.normal(k_x, (n_stack, batch_size, input_size), jnp.float32)
    # TODO(synk): torch.randn uses a different RNG stream; epsilon here is drawn
    # from jax PRNG (same N(0,1) distribution).
    epsilon = jax.random.normal(k_eps, (n_stack, batch_size, z_size), jnp.float32)

    # stacked (amortized) call: grid over the 4 independent instances
    z, mu, logsigma = variation_forward(context, params, epsilon)
    jax.block_until_ready((z, mu, logsigma))

    assert z.shape == (n_stack, batch_size, z_size)
    assert mu.shape == (n_stack, batch_size, z_size)
    assert logsigma.shape == (n_stack, batch_size, z_size)
    assert bool(jnp.all(jnp.isfinite(z)))
    assert bool(jnp.all(jnp.isfinite(mu)))
    assert bool(jnp.all(jnp.isfinite(logsigma)))

    # plain 2-D call (original module signature) also supported
    z2, mu2, ls2 = variation_forward(context[0], params, epsilon[0])
    jax.block_until_ready((z2, mu2, ls2))
    assert z2.shape == (batch_size, z_size)
    assert mu2.shape == (batch_size, z_size)
    assert ls2.shape == (batch_size, z_size)

    print("KERNEL_OK")
</pallas_src>

<mosaic_0001>
module attributes {stable_mosaic.version = 11 : i64} {
  func.func @variation_kernel(%arg0: i32, %arg1: memref<1x8x128xf32, #tpu.memory_space<vmem>>, %arg2: memref<128x128xf32, #tpu.memory_space<vmem>>, %arg3: memref<128x128xf32, #tpu.memory_space<vmem>>, %arg4: memref<128x256xf32, #tpu.memory_space<vmem>>, %arg5: memref<8x128xf32, #tpu.memory_space<vmem>>, %arg6: memref<1x8x128xf32, #tpu.memory_space<vmem>>, %arg7: memref<1x8x384xf32, #tpu.memory_space<vmem>>) attributes {dimension_semantics = [#tpu.dimension_semantics<parallel>], iteration_bounds = array<i64: 4>, scalar_prefetch = 0 : i64, scratch_operands = 0 : i64, tpu.core_type = #tpu.core_type<tc>, window_params = [{transform_indices = @transform_0, window_bounds = array<i64: 1, 8, 128>}, {pipeline_mode = #tpu.pipeline_mode<synchronous>, transform_indices = @transform_1, window_bounds = array<i64: 128, 128>}, {pipeline_mode = #tpu.pipeline_mode<synchronous>, transform_indices = @transform_2, window_bounds = array<i64: 128, 128>}, {pipeline_mode = #tpu.pipeline_mode<synchronous>, transform_indices = @transform_3, window_bounds = array<i64: 128, 256>}, {pipeline_mode = #tpu.pipeline_mode<synchronous>, transform_indices = @transform_4, window_bounds = array<i64: 8, 128>}, {transform_indices = @transform_5, window_bounds = array<i64: 1, 8, 128>}, {transform_indices = @transform_6, window_bounds = array<i64: 1, 8, 384>}]} {
    %c0 = arith.constant 0 : index
    %c0_0 = arith.constant 0 : index
    %c0_1 = arith.constant 0 : index
    %0 = vector.load %arg1[%c0, %c0_0, %c0_1] : memref<1x8x128xf32, #tpu.memory_space<vmem>>, vector<1x8x128xf32>
    %1 = vector.shape_cast %0 : vector<1x8x128xf32> to vector<8x128xf32>
    %c0_2 = arith.constant 0 : index
    %c0_3 = arith.constant 0 : index
    %2 = vector.load %arg5[%c0_2, %c0_3] : memref<8x128xf32, #tpu.memory_space<vmem>>, vector<8x128xf32>
    %c0_4 = arith.constant 0 : index
    %c0_5 = arith.constant 0 : index
    %3 = vector.load %arg2[%c0_4, %c0_5] : memref<128x128xf32, #tpu.memory_space<vmem>>, vector<128x128xf32>
    %cst = arith.constant dense<0.000000e+00> : vector<8x128xf32>
    %4 = tpu.matmul %1, %3, %cst {dimension_numbers = #tpu.dot_dimension_numbers<[1], [0], [0], [1], [0, 0, 1, 1], [], []>} : vector<8x128xf32>, vector<128x128xf32>, vector<8x128xf32> -> vector<8x128xf32>
    %5 = vector.extract_strided_slice %2 {offsets = [0, 0], sizes = [1, 128], strides = [1, 1]} : vector<8x128xf32> to vector<1x128xf32>
    %6 = vector.broadcast %5 : vector<1x128xf32> to vector<8x128xf32>
    %7 = arith.addf %4, %6 : vector<8x128xf32>
    %8 = vector.extract_strided_slice %2 {offsets = [1, 0], sizes = [1, 128], strides = [1, 1]} : vector<8x128xf32> to vector<1x128xf32>
    %9 = vector.extract_strided_slice %2 {offsets = [2, 0], sizes = [1, 128], strides = [1, 1]} : vector<8x128xf32> to vector<1x128xf32>
    %cst_6 = arith.constant dense<0.000000e+00> : vector<128xf32>
    %10 = vector.multi_reduction <add>, %7, %cst_6 [0] : vector<8x128xf32> to vector<128xf32>
    %11 = vector.shape_cast %10 : vector<128xf32> to vector<1x128xf32>
    %cst_7 = arith.constant 1.250000e-01 : f32
    %12 = vector.broadcast %cst_7 : f32 to vector<1x128xf32>
    %13 = arith.mulf %11, %12 : vector<1x128xf32>
    %14 = arith.mulf %7, %7 : vector<8x128xf32>
    %cst_8 = arith.constant dense<0.000000e+00> : vector<128xf32>
    %15 = vector.multi_reduction <add>, %14, %cst_8 [0] : vector<8x128xf32> to vector<128xf32>
    %16 = vector.shape_cast %15 : vector<128xf32> to vector<1x128xf32>
    %cst_9 = arith.constant 1.250000e-01 : f32
    %17 = vector.broadcast %cst_9 : f32 to vector<1x128xf32>
    %18 = arith.mulf %16, %17 : vector<1x128xf32>
    %19 = arith.mulf %13, %13 : vector<1x128xf32>
    %20 = arith.subf %18, %19 : vector<1x128xf32>
    %cst_10 = arith.constant 0.000000e+00 : f32
    %21 = vector.broadcast %cst_10 : f32 to vector<1x128xf32>
    %22 = arith.maximumf %20, %21 : vector<1x128xf32>
    %23 = vector.broadcast %13 : vector<1x128xf32> to vector<8x128xf32>
    %24 = arith.subf %7, %23 : vector<8x128xf32>
    %cst_11 = arith.constant 9.99999974E-6 : f32
    %25 = vector.broadcast %cst_11 : f32 to vector<1x128xf32>
    %26 = arith.addf %22, %25 : vector<1x128xf32>
    %27 = math.rsqrt %26 : vector<1x128xf32>
    %28 = vector.broadcast %27 : vector<1x128xf32> to vector<8x128xf32>
    %29 = arith.mulf %24, %28 : vector<8x128xf32>
    %30 = vector.broadcast %8 : vector<1x128xf32> to vector<8x128xf32>
    %31 = arith.mulf %29, %30 : vector<8x128xf32>
    %32 = vector.broadcast %9 : vector<1x128xf32> to vector<8x128xf32>
    %33 = arith.addf %31, %32 : vector<8x128xf32>
    %34 = math.tanh %33 : vector<8x128xf32>
    %c0_12 = arith.constant 0 : index
    %c0_13 = arith.constant 0 : index
    %35 = vector.load %arg3[%c0_12, %c0_13] : memref<128x128xf32, #tpu.memory_space<vmem>>, vector<128x128xf32>
    %cst_14 = arith.constant dense<0.000000e+00> : vector<8x128xf32>
    %36 = tpu.matmul %34, %35, %cst_14 {dimension_numbers = #tpu.dot_dimension_numbers<[1], [0], [0], [1], [0, 0, 1, 1], [], []>} : vector<8x128xf32>, vector<128x128xf32>, vector<8x128xf32> -> vector<8x128xf32>
    %37 = vector.extract_strided_slice %2 {offsets = [3, 0], sizes = [1, 128], strides = [1, 1]} : vector<8x128xf32> to vector<1x128xf32>
    %38 = vector.broadcast %37 : vector<1x128xf32> to vector<8x128xf32>
    %39 = arith.addf %36, %38 : vector<8x128xf32>
    %40 = vector.extract_strided_slice %2 {offsets = [4, 0], sizes = [1, 128], strides = [1, 1]} : vector<8x128xf32> to vector<1x128xf32>
    %41 = vector.extract_strided_slice %2 {offsets = [5, 0], sizes = [1, 128], strides = [1, 1]} : vector<8x128xf32> to vector<1x128xf32>
    %cst_15 = arith.constant dense<0.000000e+00> : vector<128xf32>
    %42 = vector.multi_reduction <add>, %39, %cst_15 [0] : vector<8x128xf32> to vector<128xf32>
    %43 = vector.shape_cast %42 : vector<128xf32> to vector<1x128xf32>
    %cst_16 = arith.constant 1.250000e-01 : f32
    %44 = vector.broadcast %cst_16 : f32 to vector<1x128xf32>
    %45 = arith.mulf %43, %44 : vector<1x128xf32>
    %46 = arith.mulf %39, %39 : vector<8x128xf32>
    %cst_17 = arith.constant dense<0.000000e+00> : vector<128xf32>
    %47 = vector.multi_reduction <add>, %46, %cst_17 [0] : vector<8x128xf32> to vector<128xf32>
    %48 = vector.shape_cast %47 : vector<128xf32> to vector<1x128xf32>
    %cst_18 = arith.constant 1.250000e-01 : f32
    %49 = vector.broadcast %cst_18 : f32 to vector<1x128xf32>
    %50 = arith.mulf %48, %49 : vector<1x128xf32>
    %51 = arith.mulf %45, %45 : vector<1x128xf32>
    %52 = arith.subf %50, %51 : vector<1x128xf32>
    %cst_19 = arith.constant 0.000000e+00 : f32
    %53 = vector.broadcast %cst_19 : f32 to vector<1x128xf32>
    %54 = arith.maximumf %52, %53 : vector<1x128xf32>
    %55 = vector.broadcast %45 : vector<1x128xf32> to vector<8x128xf32>
    %56 = arith.subf %39, %55 : vector<8x128xf32>
    %cst_20 = arith.constant 9.99999974E-6 : f32
    %57 = vector.broadcast %cst_20 : f32 to vector<1x128xf32>
    %58 = arith.addf %54, %57 : vector<1x128xf32>
    %59 = math.rsqrt %58 : vector<1x128xf32>
    %60 = vector.broadcast %59 : vector<1x128xf32> to vector<8x128xf32>
    %61 = arith.mulf %56, %60 : vector<8x128xf32>
    %62 = vector.broadcast %40 : vector<1x128xf32> to vector<8x128xf32>
    %63 = arith.mulf %61, %62 : vector<8x128xf32>
    %64 = vector.broadcast %41 : vector<1x128xf32> to vector<8x128xf32>
    %65 = arith.addf %63, %64 : vector<8x128xf32>
    %66 = math.tanh %65 : vector<8x128xf32>
    %c0_21 = arith.constant 0 : index
    %c0_22 = arith.constant 0 : index
    %67 = vector.load %arg4[%c0_21, %c0_22] : memref<128x256xf32, #tpu.memory_space<vmem>>, vector<128x256xf32>
    %cst_23 = arith.constant dense<0.000000e+00> : vector<8x256xf32>
    %68 = tpu.matmul %66, %67, %cst_23 {dimension_numbers = #tpu.dot_dimension_numbers<[1], [0], [0], [1], [0, 0, 1, 1], [], []>} : vector<8x128xf32>, vector<128x256xf32>, vector<8x256xf32> -> vector<8x256xf32>
    %69 = vector.extract_strided_slice %68 {offsets = [0, 0], sizes = [8, 128], strides = [1, 1]} : vector<8x256xf32> to vector<8x128xf32>
    %70 = vector.extract_strided_slice %2 {offsets = [6, 0], sizes = [1, 128], strides = [1, 1]} : vector<8x128xf32> to vector<1x128xf32>
    %71 = vector.broadcast %70 : vector<1x128xf32> to vector<8x128xf32>
    %72 = arith.addf %69, %71 : vector<8x128xf32>
    %73 = vector.extract_strided_slice %68 {offsets = [0, 128], sizes = [8, 128], strides = [1, 1]} : vector<8x256xf32> to vector<8x128xf32>
    %74 = vector.extract_strided_slice %2 {offsets = [7, 0], sizes = [1, 128], strides = [1, 1]} : vector<8x128xf32> to vector<1x128xf32>
    %75 = vector.broadcast %74 : vector<1x128xf32> to vector<8x128xf32>
    %76 = arith.addf %73, %75 : vector<8x128xf32>
    %cst_24 = arith.constant 5.000000e-01 : f32
    %77 = vector.broadcast %cst_24 : f32 to vector<8x128xf32>
    %78 = arith.mulf %77, %76 : vector<8x128xf32>
    %79 = math.exp %78 : vector<8x128xf32>
    %c0_25 = arith.constant 0 : index
    %c0_26 = arith.constant 0 : index
    %c0_27 = arith.constant 0 : index
    %80 = vector.load %arg6[%c0_25, %c0_26, %c0_27] : memref<1x8x128xf32, #tpu.memory_space<vmem>>, vector<1x8x128xf32>
    %81 = vector.shape_cast %80 : vector<1x8x128xf32> to vector<8x128xf32>
    %82 = arith.mulf %81, %79 : vector<8x128xf32>
    %83 = arith.addf %82, %72 : vector<8x128xf32>
    %c0_28 = arith.constant 0 : index
    %c0_29 = arith.constant 0 : index
    %c0_30 = arith.constant 0 : index
    %84 = vector.load %arg7[%c0_28, %c0_29, %c0_30] : memref<1x8x384xf32, #tpu.memory_space<vmem>>, vector<1x8x128xf32>
    %85 = vector.shape_cast %84 : vector<1x8x128xf32> to vector<8x128xf32>
    %86 = vector.shape_cast %83 : vector<8x128xf32> to vector<1x8x128xf32>
    tpu.vector_store %arg7[%c0_28, %c0_29, %c0_30], %86 {strides = array<i32>} : memref<1x8x384xf32, #tpu.memory_space<vmem>>, vector<1x8x128xf32>,
    %c0_31 = arith.constant 0 : index
    %c0_32 = arith.constant 0 : index
    %c128 = arith.constant 128 : index
    %87 = vector.load %arg7[%c0_31, %c0_32, %c128] : memref<1x8x384xf32, #tpu.memory_space<vmem>>, vector<1x8x128xf32>
    %88 = vector.shape_cast %87 : vector<1x8x128xf32> to vector<8x128xf32>
    %89 = vector.shape_cast %72 : vector<8x128xf32> to vector<1x8x128xf32>
    tpu.vector_store %arg7[%c0_31, %c0_32, %c128], %89 {strides = array<i32>} : memref<1x8x384xf32, #tpu.memory_space<vmem>>, vector<1x8x128xf32>,
    %c0_33 = arith.constant 0 : index
    %c0_34 = arith.constant 0 : index
    %c256 = arith.constant 256 : index
    %90 = vector.load %arg7[%c0_33, %c0_34, %c256] : memref<1x8x384xf32, #tpu.memory_space<vmem>>, vector<1x8x128xf32>
    %91 = vector.shape_cast %90 : vector<1x8x128xf32> to vector<8x128xf32>
    %92 = vector.shape_cast %76 : vector<8x128xf32> to vector<1x8x128xf32>
    tpu.vector_store %arg7[%c0_33, %c0_34, %c256], %92 {strides = array<i32>} : memref<1x8x384xf32, #tpu.memory_space<vmem>>, vector<1x8x128xf32>,
    return
  }
  func.func @transform_0(%arg0: i32) -> (i32, i32, i32) {
    %c0_i32 = arith.constant 0 : i32
    %c0_i32_0 = arith.constant 0 : i32
    %c0_i32_1 = arith.constant 0 : i32
    return %arg0, %c0_i32, %c0_i32_0 : i32, i32, i32
  }
  func.func @transform_1(%arg0: i32) -> (i32, i32) {
    %c0_i32 = arith.constant 0 : i32
    %c0_i32_0 = arith.constant 0 : i32
    %c0_i32_1 = arith.constant 0 : i32
    return %c0_i32, %c0_i32_0 : i32, i32
  }
  func.func @transform_2(%arg0: i32) -> (i32, i32) {
    %c0_i32 = arith.constant 0 : i32
    %c0_i32_0 = arith.constant 0 : i32
    %c0_i32_1 = arith.constant 0 : i32
    return %c0_i32, %c0_i32_0 : i32, i32
  }
  func.func @transform_3(%arg0: i32) -> (i32, i32) {
    %c0_i32 = arith.constant 0 : i32
    %c0_i32_0 = arith.constant 0 : i32
    %c0_i32_1 = arith.constant 0 : i32
    return %c0_i32, %c0_i32_0 : i32, i32
  }
  func.func @transform_4(%arg0: i32) -> (i32, i32) {
    %c0_i32 = arith.constant 0 : i32
    %c0_i32_0 = arith.constant 0 : i32
    %c0_i32_1 = arith.constant 0 : i32
    return %c0_i32, %c0_i32_0 : i32, i32
  }
  func.func @transform_5(%arg0: i32) -> (i32, i32, i32) {
    %c0_i32 = arith.constant 0 : i32
    %c0_i32_0 = arith.constant 0 : i32
    %c0_i32_1 = arith.constant 0 : i32
    return %arg0, %c0_i32, %c0_i32_0 : i32, i32, i32
  }
  func.func @transform_6(%arg0: i32) -> (i32, i32, i32) {
    %c0_i32 = arith.constant 0 : i32
    %c0_i32_0 = arith.constant 0 : i32
    %c0_i32_1 = arith.constant 0 : i32
    return %arg0, %c0_i32, %c0_i32_0 : i32, i32, i32
  }
}

</mosaic_0001>

<bundles_post_ra>
// kernel: tpu_custom_call.1
= control target key start
LH: loop header
LB: loop body
LE: loop exit
PB: predicated region body
PF: predicated region fallthrough
CT: control target
= control target key end

     0   :  { %s1749_s0 = inlined_call_operand.hbm [shape: f32[4,8,128], index: 0, kind: input, shape index: {}]   ;;  %s1750_s1 = inlined_call_operand.hbm [shape: f32[128,128], index: 1, kind: input, shape index: {}]   ;;  %s1751_s2 = inlined_call_operand.hbm [shape: f32[128,128], index: 2, kind: input, shape index: {}]   ;;  %s1752_s3 = inlined_call_operand.hbm [shape: f32[128,256], index: 3, kind: input, shape index: {}]   ;;  %s1753_s4 = inlined_call_operand.vmem [shape: f32[8,128], index: 4, kind: input, shape index: {}]   ;;  %s1754_s5 = inlined_call_operand.hbm [shape: f32[4,8,128], index: 5, kind: input, shape index: {}]   ;;  %s1755_s6 = inlined_call_operand.hbm [shape: f32[4,8,384], index: 6, kind: output, shape index: {}]  }
   0x1   :  { %1773 = sst [smem:[#allocation23_spill]] %s1749_s0 }
   0x2   :  { %1774 = sst [smem:[#allocation24_spill]] %s1750_s1 }
   0x3   :  { %11 = vsyncpa [#allocation3], 0 }
   0x4   :  { %13 = vsyncpa [#allocation3 + $0x1], 0 }
   0x5   :  { %14 = vsyncpa [#allocation6], 0 }
   0x6   :  { %15 = vsyncpa [#allocation9], 0 }
   0x7   :  { %16 = vsyncpa [#allocation4], 0 }
   0x8   :  { %18 = vsyncpa [#allocation4 + $0x1], 0  ;;  %s1425_s21 = smov 0   ;;  %s1427_s22 = smov 0  }
   0x9   :  { %s1429_s23 = smov 0   ;;  %s1431_s24 = smov 0  }
   0xa LB: > { %1775 = sst [smem:[#allocation17_spill]] %s1363_s21  ;;  %s1446_s25 = sadd.s32 4294967295, %s1375_s24   ;;  %s1375_s24 = sphi %s1431_s24, %s1808_s24   ;;  %s1371_s23 = sphi %s1429_s23, %s1810_s23   ;;  %s1367_s22 = sphi %s1427_s22, %s1812_s22   ;;  %s1363_s21 = sphi %s1425_s21, %s1811_s21  }
   0xb   : > { %1776 = sst [smem:[#allocation18_spill]] %s1371_s23  ;;  %s849_s26 = sadd.s32 4294967294, %s1375_s24  }
   0xc   : > { %1777 = sst [smem:[#allocation19_spill]] %s1375_s24  ;;  %p44_p0 = scmp.ne.s32.totalorder %s1367_s22, %s1363_s21 }
   0xd   : > { %p1756_p1 = scmp.eq.s32.totalorder %s1446_s25, 0  ;;  %p184_p3 = scmp.eq.s32.totalorder %s849_s26, 3 }
   0xe   : > { %p850_p5 = scmp.ge.s32.totalorder %s1375_s24, 1  ;;  %p191_p7 = scmp.lt.s32.totalorder %s1375_s24, 5 }
   0xf   : > { %p1455_p4 = por %p1756_p1, %p44_p0  ;;  %p1460_p6 = por %p184_p3, %p44_p0 }
  0x10   : > { %p1465_p8 = pnand %p850_p5, %p191_p7  ;;  %s1377_s30 = smov [#allocation5]  }
  0x11   : > { %s1778_s27 = scalar_select %p1455_p4, 1, 0 }
  0x12   : > { %s1779_s28 = scalar_select %p1460_p6, 1, 0 }
  0x13   : > { %s1781_s29 = scalar_select %p1465_p8, 1, 0 }
  0x14   : > { %1780 = sst [smem:[#allocation20_spill]] %s1779_s28  ;;  %s203_s7 = sshll.u32 %s1377_s30, 4  ;;  %s204_s7 = int_to_ptr.vmem [resolvable:$true] %s203_s7 }
  0x15   : > { %p1072_p9 = pneg %p1465_p8  ;;  %s1478_s9 = sadd.s32 1, %s1375_s24  }
  0x16   : > { %1783 = sst [smem:[#allocation21_spill]] %s1478_s9  ;;  %s31_s10 = sadd.s32 1, %s1371_s23 }
  0x17   : > { %p1473_p10 = pnand %p1072_p9, %p1756_p1  ;;  %s28_s11 = ssub.s32 %s1375_s24, %s1478_s9 }
  0x18   : > { %s1784_s1 = sld [smem:[#allocation24_spill]] }
  0x19   : > { %s1782_s8 = scalar_select %p1473_p10, 1, 0 }
  0x1a   : > { %p1491_p12 = pneg %p1473_p10 }
  0x1e   : > { %s1153_s14 = scalar_lea.hbm %s1784_s1, 2048 }
  0x1f   : > { %p1154_p11 = scmp.ne.s32.totalorder %s1784_s1, %s1153_s14  ;;  %p1160_p3 = scmp.lt.u32.totalorder %s1153_s14, %s1784_s1 }
  0x21   : > { %p1156_p13 = pnand %p1491_p12, %p1154_p11 }
  0x23   : > { %p1157_p0 = pneg %p1156_p13 }
  0x25   : > { %p1162_p5 = pnand %p1160_p3, %p1157_p0 }
  0x27   : > { %1165 = shalt.err (!%p1162_p5)
}
  0x28   : > { %s1166_s20 = scalar_lea.vmem %s204_s7, 2048  ;;  %p1174_p2 = scmp.lt.s32.totalorder %s204_s7, %s204_s7 }
  0x29   : > { %p1167_p7 = scmp.ne.s32.totalorder %s204_s7, %s1166_s20  ;;  %p1175_p6 = scmp.lt.s32.totalorder %s1166_s20, %s1166_s20 }
  0x2b   : > { %p1169_p9 = pnand %p1167_p7, %p1491_p12  ;;  %p1176_p4 = por %p1175_p6, %p1174_p2 }
  0x2d   : > { %p1170_p1 = pneg %p1169_p9 }
  0x2f   : > { %p1177_p8 = pnand %p1176_p4, %p1170_p1 }
  0x31   : > { %1180 = shalt.err (!%p1177_p8)
}
  0x32   : > { %s1759_s26 = smov 128   ;;  %s1760_s30 = smov 8  }
  0x33   : > { %1075 = dma.hbm_to_vmem [thread:$0]  (!%p1473_p10), %s1784_s1, 2048, %s204_s7, [#allocation6], %s1759_s26, %s1759_s26, %s1760_s30  }
  0x34   : > { %p29_p1 = scmp.eq.s32.totalorder %s28_s11, 0  ;;  %p38_p2 = scmp.ne.s32.totalorder %s1371_s23, %s1367_s22 }
  0x35   : > { %p39_p4 = scmp.eq.s32.totalorder %s1375_s24, 0  ;;  %p1096_p6 = scmp.lt.s32.totalorder %s1375_s24, 4 }
  0x36   : > { %s1515_s14 = scalar_select %p29_p1, %s1371_s23, %s31_s10  }
  0x37   : > { %p40_p8 = por %p39_p4, %p38_p2  ;;  %p1787_p11 = scmp.eq.s32.totalorder %s1446_s25, 3 }
  0x38   : > { %1786 = sst [smem:[#allocation22_spill]] %s1515_s14  ;;  %s246_s16 = sand.u32 1, %s1375_s24  }
  0x39   : > { %p1519_p13 = por %p1787_p11, %p38_p2  ;;  %s248_s18 = sand.u32 1, %s1371_s23  }
  0x3a   : > { %s1525_s19 = sshll.u32 %s248_s18, 3  ;;  %s856_s20 = sshll.u32 %s1375_s24, 7 }
  0x3b   : > { %s1788_s15 = scalar_select %p1519_p13, 1, 0 }
  0x3c   : > { %s1789_s0 = sld [smem:[#allocation23_spill]]  ;;  %s250_s10 = scalar_lea.vmem [#allocation2], %s1525_s19 }
  0x3d   : > { %s257_s13 = sshll.u32 %s250_s10, 4  ;;  %p1536_p0 = pnand %p1096_p6, %p40_p8  ;;  %s1534_s13 = int_to_ptr.vmem [resolvable:$true] %s257_s13 }
  0x3e   : > { %s1543_s12 = scalar_lea.hbm %s1754_s5, %s856_s20  ;;  %s1545_s7 = scalar_lea.sflag [#allocation3], %s246_s16 }
  0x3f   : > { %s1790_s26 = scalar_select %p1536_p0, 1, 0 }
  0x40   : > { %p1768_p5 = pneg %p1536_p0 }
  0x42   : > { %s1531_s11 = scalar_lea.hbm %s1789_s0, %s856_s20  ;;  %s1186_s23 = scalar_lea.hbm %s1789_s0, 512 }
  0x43   : > { %s1181_s1 = scalar_lea.hbm %s1531_s11, 128  ;;  %p1187_p1 = scmp.lt.u32.totalorder %s1531_s11, %s1789_s0 }
  0x44   : > { %p1182_p3 = scmp.ne.s32.totalorder %s1531_s11, %s1181_s1  ;;  %p1188_p2 = scmp.lt.u32.totalorder %s1186_s23, %s1181_s1 }
  0x45   : > { %p1190_p6 = scmp.lt.u32.totalorder %s1181_s1, %s1531_s11 }
  0x46   : > { %p1184_p7 = pnand %p1768_p5, %p1182_p3  ;;  %p1189_p4 = por %p1188_p2, %p1187_p1 }
  0x48   : > { %p1185_p9 = pneg %p1184_p7  ;;  %p1191_p8 = por %p1190_p6, %p1189_p4 }
  0x4a   : > { %p1192_p11 = pnand %p1191_p8, %p1185_p9 }
  0x4c   : > { %1195 = shalt.err (!%p1192_p11)
}
  0x4d   : > { %s1196_s16 = scalar_lea.vmem %s1534_s13, 128  ;;  %s1380_s14 = smov [#allocation2]  }
  0x4e   : > { %p1197_p3 = scmp.ne.s32.totalorder %s1534_s13, %s1196_s16  ;;  %s1201_s20 = sshll.u32 %s1380_s14, 4  ;;  %s1202_s20 = int_to_ptr.vmem [resolvable:$false] %s1201_s20 }
  0x4f   : > { %s1203_s9 = scalar_lea.vmem %s1202_s20, 256  ;;  %p1204_p10 = scmp.lt.s32.totalorder %s1534_s13, %s1202_s20 }
  0x50   : > { %p1199_p7 = pnand %p1197_p3, %p1768_p5  ;;  %p1205_p1 = scmp.lt.s32.totalorder %s1203_s9, %s1196_s16 }
  0x52   : > { %p1200_p13 = pneg %p1199_p7  ;;  %p1206_p2 = por %p1205_p1, %p1204_p10 }
  0x54   : > { %p1207_p4 = pnand %p1206_p2, %p1200_p13 }
  0x56   : > { %1210 = shalt.err (!%p1207_p4)
}
  0x57   : > { %1085 = dma.hbm_to_vmem [thread:$0]  (!%p1536_p0), %s1531_s11, 128, %s1534_s13, %s1545_s7  }
  0x58   : > { %s1381_s1 = smov [#allocation7]   ;;  %s1382_s18 = smov [#allocation8]  }
  0x59   : > { %s216_s23 = sshll.u32 %s1381_s1, 4  ;;  %s229_s10 = sshll.u32 %s1382_s18, 4  ;;  %s217_s23 = int_to_ptr.vmem [resolvable:$true] %s216_s23  ;;  %s230_s10 = int_to_ptr.vmem [resolvable:$true] %s229_s10 }
  0x5a   : > { %s1211_s20 = scalar_lea.hbm %s1751_s2, 2048 }
  0x5b   : > { %p1212_p10 = scmp.ne.s32.totalorder %s1751_s2, %s1211_s20  ;;  %p1218_p6 = scmp.lt.u32.totalorder %s1211_s20, %s1751_s2 }
  0x5d   : > { %p1214_p13 = pnand %p1212_p10, %p1491_p12 }
  0x5f   : > { %p1215_p9 = pneg %p1214_p13 }
  0x61   : > { %p1220_p8 = pnand %p1218_p6, %p1215_p9 }
  0x63   : > { %1223 = shalt.err (!%p1220_p8)
}
  0x64   : > { %s1224_s11 = scalar_lea.vmem %s217_s23, 2048  ;;  %p1232_p1 = scmp.lt.s32.totalorder %s217_s23, %s217_s23 }
  0x65   : > { %p1225_p11 = scmp.ne.s32.totalorder %s217_s23, %s1224_s11  ;;  %p1233_p2 = scmp.lt.s32.totalorder %s1224_s11, %s1224_s11 }
  0x67   : > { %p1227_p3 = pnand %p1225_p11, %p1491_p12  ;;  %p1234_p4 = por %p1233_p2, %p1232_p1 }
  0x69   : > { %p1228_p7 = pneg %p1227_p3 }
  0x6b   : > { %p1235_p5 = pnand %p1234_p4, %p1228_p7 }
  0x6d   : > { %1238 = shalt.err (!%p1235_p5)
}
  0x6e   : > { %p1791_p10 = scmp.ne.s32.totalorder %s1782_s8, 0  ;;  %s1792_s13 = smov 8  }
  0x6f   : > { %s1793_s1 = smov 128   ;;  %s268_s18 = scalar_lea.vmem [#allocation10], %s1525_s19 }
  0x70   : > { %1078 = dma.hbm_to_vmem [thread:$0]  (!%p1791_p10), %s1751_s2, 2048, %s217_s23, [#allocation6], %s1793_s1, %s1793_s1, %s1792_s13  }
  0x71   : > { %s275_s30 = sshll.u32 %s268_s18, 4  ;;  %s1239_s16 = scalar_lea.hbm %s1752_s3, 4096  ;;  %s276_s30 = int_to_ptr.vmem [resolvable:$true] %s275_s30 }
  0x72   : > { %p1240_p5 = scmp.ne.s32.totalorder %s1752_s3, %s1239_s16  ;;  %p1246_p6 = scmp.lt.u32.totalorder %s1239_s16, %s1752_s3 }
  0x74   : > { %p1242_p13 = pnand %p1240_p5, %p1491_p12 }
  0x76   : > { %p1243_p9 = pneg %p1242_p13 }
  0x78   : > { %p1248_p8 = pnand %p1246_p6, %p1243_p9 }
  0x7a   : > { %1251 = shalt.err (!%p1248_p8)
}
  0x7b   : > { %s1252_s23 = scalar_lea.vmem %s230_s10, 4096  ;;  %p1260_p1 = scmp.lt.s32.totalorder %s230_s10, %s230_s10 }
  0x7c   : > { %p1253_p11 = scmp.ne.s32.totalorder %s230_s10, %s1252_s23  ;;  %p1261_p2 = scmp.lt.s32.totalorder %s1252_s23, %s1252_s23 }
  0x7e   : > { %p1255_p3 = pnand %p1253_p11, %p1491_p12  ;;  %p1262_p4 = por %p1261_p2, %p1260_p1 }
  0x80   : > { %p1256_p7 = pneg %p1255_p3 }
  0x82   : > { %p1263_p0 = pnand %p1262_p4, %p1256_p7 }
  0x84   : > { %1266 = shalt.err (!%p1263_p0)
}
  0x85   : > { %s1383_s19 = smov 256   ;;  %s1384_s21 = smov 16  }
  0x86   : > { %1081 = dma.hbm_to_vmem [thread:$0]  (!%p1791_p10), %s1752_s3, 4096, %s230_s10, [#allocation9], %s1383_s19, %s1383_s19, %s1384_s21  }
  0x87   : > { %s1267_s17 = scalar_lea.hbm %s1543_s12, 128  ;;  %p1794_p5 = scmp.ne.s32.totalorder %s1790_s26, 0 }
  0x88   : > { %p1268_p12 = scmp.ne.s32.totalorder %s1543_s12, %s1267_s17  ;;  %s1272_s28 = scalar_lea.hbm %s1754_s5, 512 }
  0x89   : > { %p1795_p13 = pneg %p1794_p5  ;;  %p1273_p6 = scmp.lt.u32.totalorder %s1543_s12, %s1754_s5 }
  0x8a   : > { %p1274_p8 = scmp.lt.u32.totalorder %s1272_s28, %s1267_s17  ;;  %p1276_p3 = scmp.lt.u32.totalorder %s1267_s17, %s1543_s12 }
  0x8b   : > { %p1270_p9 = pnand %p1268_p12, %p1795_p13 }
  0x8c   : > { %p1275_p11 = por %p1274_p8, %p1273_p6 }
  0x8d   : > { %p1271_p0 = pneg %p1270_p9 }
  0x8e   : > { %p1277_p7 = por %p1276_p3, %p1275_p11 }
  0x90   : > { %p1278_p10 = pnand %p1277_p7, %p1271_p0 }
  0x92   : > { %1281 = shalt.err (!%p1278_p10)
}
  0x93   : > { %s1282_s8 = scalar_lea.vmem %s276_s30, 128  ;;  %p1796_p2 = pmov %p1795_p13 }
  0x94   : > { %p1283_p1 = scmp.ne.s32.totalorder %s276_s30, %s1282_s8  ;;  %s1385_s10 = smov [#allocation10]  }
  0x95   : > { %s1287_s20 = sshll.u32 %s1385_s10, 4  ;;  %s1288_s20 = int_to_ptr.vmem [resolvable:$false] %s1287_s20 }
  0x96   : > { %p1285_p4 = pnand %p1283_p1, %p1796_p2  ;;  %s1289_s16 = scalar_lea.vmem %s1288_s20, 256 }
  0x97   : > { %p1290_p13 = scmp.lt.s32.totalorder %s276_s30, %s1288_s20  ;;  %p1291_p9 = scmp.lt.s32.totalorder %s1289_s16, %s1282_s8 }
  0x98   : > { %p1286_p12 = pneg %p1285_p4 }
  0x99   : > { %p1292_p6 = por %p1291_p9, %p1290_p13 }
  0x9b   : > { %p1293_p8 = pnand %p1292_p6, %p1286_p12 }
  0x9d   : > { %1296 = shalt.err (!%p1293_p8)
}
  0x9e   : > { %1088 = dma.hbm_to_vmem [thread:$0]  (!%p1794_p5), %s1543_s12, 128, %s276_s30, %s1545_s7  }
  0x9f   : > { %p1797_p0 = scmp.ne.s32.totalorder %s1781_s29, 0 }
  0xa0   : > { %s286_s9 = sand.u32 (!%p1797_p0), 1, %s1446_s25   ;;  %s1637_s11 = sand.u32 (!%p1797_p0), 1, %s1367_s22  }
  0xa1   : > { %284 = sbr.rel (%p1797_p0) target bundleno = 988 (0x3dc), region = 44  ;;  %s860_s23 = sshll.u32 (!%p1797_p0), %s1637_s11, 3 }
  0xa2   : > { %s287_s19 = scalar_lea.sflag (!%p1797_p0), [#allocation3], %s286_s9  ;;  %s1640_s21 = scalar_lea.vmem (!%p1797_p0), [#allocation2], %s860_s23 }
  0xa3   : > { %p1798_p11 = scmp.ne.s32.totalorder (!%p1797_p0), %s1778_s27, 0 }
  0xa8   : > { %1342 = dma.done.wait (%p1798_p11), %s287_s19, 128  }
  0xa9   : > { %1344 = vsyncadd (%p1798_p11), %s287_s19, 4294967168  ;;  %p1799_p5 = scmp.eq.s32.totalorder %s1446_s25, 0 }
  0xab   : > { %1346 = dma.done.wait (%p1799_p5), [#allocation6], 4096   ;;  %p1800_p3 = pmov %p1799_p5 }
  0xad   : > { %1348 = vsyncadd (%p1800_p3), [#allocation6], 4294963200  ;;  %p1801_p7 = pmov %p1800_p3 }
  0xae   : > { %p1802_p10 = pmov %p1800_p3 }
  0xaf   : > { %1350 = dma.done.wait (%p1801_p7), [#allocation9], 4096  }
  0xb0   : > { %1352 = vsyncadd (%p1802_p10), [#allocation9], 4294963200  ;;  %s1654_s29 = scalar_lea.vmem [#allocation10], %s860_s23 }
  0xb1   : > { %1354 = dma.done.wait (%p1798_p11), %s287_s19, 128  }
  0xb2   : > { %1356 = vsyncadd (%p1798_p11), %s287_s19, 4294967168  ;;  %v1386_v0 = vmov 0.0|0.0   ;;  %vm1387_vm0 = vmmov 0   ;;  %v1388_v1 = vmov 0.0   ;;  %v347_v2 = vld [vmem:[#allocation5] sm:$0xff]  ;;  %v348_v3 = vld [vmem:[#allocation5 + $0x8] sm:$0xff]  ;;  %v363_v51 = vlaneseq }
  0xb3   : > { %972 = vmatprep.subr.bf16.mxu0 %v1386_v0  ;;  %934 = vmatprep.mubr.msk.f32.mxu0 %vm1387_vm0, %v1388_v1  ;;  %v349_v4 = vld [vmem:[#allocation5 + $0x10] sm:$0xff]  ;;  %v973_v5 = vpack.c.bf16 %v348_v3, %v347_v2  ;;  %v350_v6 = vld [vmem:[#allocation5 + $0x18] sm:$0xff]  ;;  %v351_v8 = vld [vmem:[#allocation5 + $0x20] sm:$0xff]  ;;  %s1052_s12 = smul.u32 24, %s1637_s11  ;;  %s716_s0 = scalar_lea.sflag [#allocation4], %s1637_s11 }
  0xb4   : > { %996 = vmatprep.subr.bf16.mxu1 %v1386_v0  ;;  %969 = vmatprep.mubr.msk.f32.mxu1 %vm1387_vm0, %v1388_v1  ;;  %v976_v7 = vpack.c.bf16 %v350_v6, %v349_v4  ;;  %v352_v9 = vld [vmem:[#allocation5 + $0x28] sm:$0xff]  ;;  %v353_v11 = vld [vmem:[#allocation5 + $0x30] sm:$0xff]  ;;  %v354_v12 = vld [vmem:[#allocation5 + $0x38] sm:$0xff]  ;;  %v1677_v52 = vshrl.u32 %v363_v51, 7  ;;  %s1053_s30 = smul.u32 384, %s1446_s25  ;;  %p1803_p2 = scmp.ne.s32.totalorder %s1788_s15, 0 }
  0xb5   : > { %974 = vmatpush3.bf16.msra.mxu0 %v973_v5  ;;  %v979_v10 = vpack.c.bf16 %v352_v9, %v351_v8  ;;  %v982_v13 = vpack.c.bf16 %v354_v12, %v353_v11  ;;  %v355_v14 = vld [vmem:[#allocation5 + $0x40] sm:$0xff]  ;;  %v356_v15 = vld [vmem:[#allocation5 + $0x48] sm:$0xff]  ;;  %v357_v17 = vld [vmem:[#allocation5 + $0x50] sm:$0xff]  ;;  %s344_s7 = scalar_lea.vmem [#allocation11], %s1052_s12  ;;  %s1389_s25 = smov [#allocation11]  }
  0xb6   : > { %975 = vmatprep.subr.bf16.mxu0 %v1386_v0  ;;  %v985_v16 = vpack.c.bf16 %v356_v15, %v355_v14  ;;  %v358_v18 = vld [vmem:[#allocation5 + $0x58] sm:$0xff]  ;;  %v359_v20 = vld [vmem:[#allocation5 + $0x60] sm:$0xff]  ;;  %v360_v21 = vld [vmem:[#allocation5 + $0x68] sm:$0xff]  ;;  %v365_v53 = vsub.s32 0, %v1677_v52  ;;  %v461_v14 = vsub.s32 1, %v1677_v52  ;;  %v466_v15 = vsub.s32 2, %v1677_v52  ;;  %s1706_s1 = scalar_lea.hbm %s1755_s6, %s1053_s30 }
  0xb7   : > { %v988_v19 = vpack.c.bf16 %v358_v18, %v357_v17  ;;  %v991_v22 = vpack.c.bf16 %v360_v21, %v359_v20  ;;  %v361_v23 = vld [vmem:[#allocation5 + $0x70] sm:$0xff]  ;;  %v362_v24 = vld [vmem:[#allocation5 + $0x78] sm:$0xff]  ;;  %v470_v27 = vld [vmem:[#allocation7] sm:$0xff]  ;;  %s730_s24 = sshll.u32 %s344_s7, 4  ;;  %s1301_s18 = sshll.u32 %s1389_s25, 4  ;;  %s1708_s24 = int_to_ptr.vmem [resolvable:$true] %s730_s24  ;;  %s1302_s18 = int_to_ptr.vmem [resolvable:$false] %s1301_s18 }
  0xb8   : > { %v994_v25 = vpack.c.bf16 %v362_v24, %v361_v23  ;;  %v345_v26 = vld [vmem:[%s1640_s21] sm:$0xff]  ;;  %v471_v28 = vld [vmem:[#allocation7 + $0x8] sm:$0xff]  ;;  %v474_v33 = vld [vmem:[#allocation7 + $0x20] sm:$0xff]  ;;  %s1297_s28 = scalar_lea.vmem %s1708_s24, 384  ;;  %s1303_s14 = scalar_lea.vmem %s1302_s18, 768 }
  0xb9   : > { %977 = vmatpush3.bf16.msra.mxu0 %v976_v7  ;;  %v997_v29 = vpack.c.bf16 %v471_v28, %v470_v27  ;;  %v472_v30 = vld [vmem:[#allocation7 + $0x10] sm:$0xff]  ;;  %v473_v31 = vld [vmem:[#allocation7 + $0x18] sm:$0xff]  ;;  %v475_v34 = vld [vmem:[#allocation7 + $0x28] sm:$0xff]  ;;  %p1298_p1 = scmp.ne.s32.totalorder %s1708_s24, %s1297_s28  ;;  %p1304_p13 = scmp.lt.s32.totalorder %s1708_s24, %s1302_s18 }
  0xba   : > { %978 = vmatprep.subr.bf16.mxu0 %v1386_v0  ;;  %v1000_v32 = vpack.c.bf16 %v473_v31, %v472_v30  ;;  %v1003_v35 = vpack.c.bf16 %v475_v34, %v474_v33  ;;  %v476_v36 = vld [vmem:[#allocation7 + $0x30] sm:$0xff]  ;;  %v477_v37 = vld [vmem:[#allocation7 + $0x38] sm:$0xff]  ;;  %v478_v39 = vld [vmem:[#allocation7 + $0x40] sm:$0xff]  ;;  %p1305_p9 = scmp.lt.s32.totalorder %s1303_s14, %s1297_s28 }
  0xbb   : > { %998 = vmatpush3.bf16.msra.mxu1 %v997_v29  ;;  %v1006_v38 = vpack.c.bf16 %v477_v37, %v476_v36  ;;  %v479_v40 = vld [vmem:[#allocation7 + $0x48] sm:$0xff]  ;;  %v480_v42 = vld [vmem:[#allocation7 + $0x50] sm:$0xff]  ;;  %v481_v43 = vld [vmem:[#allocation7 + $0x58] sm:$0xff]  ;;  %p1299_p4 = pnand %p1298_p1, %p1803_p2 }
  0xbc   : > { %999 = vmatprep.subr.bf16.mxu1 %v1386_v0  ;;  %v1009_v41 = vpack.c.bf16 %v479_v40, %v478_v39  ;;  %v1012_v44 = vpack.c.bf16 %v481_v43, %v480_v42  ;;  %v482_v45 = vld [vmem:[#allocation7 + $0x60] sm:$0xff]  ;;  %v483_v46 = vld [vmem:[#allocation7 + $0x68] sm:$0xff]  ;;  %v484_v48 = vld [vmem:[#allocation7 + $0x70] sm:$0xff]  ;;  %p1306_p6 = por %p1305_p9, %p1304_p13 }
  0xbd   : > { %980 = vmatpush3.bf16.msra.mxu0 %v979_v10  ;;  %v1015_v47 = vpack.c.bf16 %v483_v46, %v482_v45  ;;  %v485_v49 = vld [vmem:[#allocation7 + $0x78] sm:$0xff]  ;;  %v1683_v54 = vld [vmem:[%s1753_s4] sm:$0xff]  ;;  %v594_v24 = vld [vmem:[#allocation8 + $0x8] sm:$0xff]  ;;  %p1300_p12 = pneg %p1299_p4 }
  0xbe   : > { %981 = vmatprep.subr.bf16.mxu0 %v1386_v0  ;;  %v1018_v50 = vpack.c.bf16 %v485_v49, %v484_v48  ;;  %v366_v55 = vrot.slane %v1683_v54, %v365_v53  ;;  %v462_v17 = vrot.slane %v1683_v54, %v461_v14  ;;  %v467_v20 = vrot.slane %v1683_v54, %v466_v15  ;;  %v593_v27 = vld [vmem:[#allocation8] sm:$0xff]  ;;  %v595_v28 = vld [vmem:[#allocation8 + $0x10] sm:$0xff]  ;;  %v598_v30 = vld [vmem:[#allocation8 + $0x28] sm:$0xff] }
  0xbf   : > { %1001 = vmatpush3.bf16.msra.mxu1 %v1000_v32  ;;  %v1022_v29 = vpack.c.bf16 %v595_v28, %v593_v27  ;;  %v600_v31 = vld [vmem:[#allocation8 + $0x38] sm:$0xff]  ;;  %v597_v33 = vld [vmem:[#allocation8 + $0x20] sm:$0xff]  ;;  %v599_v34 = vld [vmem:[#allocation8 + $0x30] sm:$0xff]  ;;  %p1307_p8 = pnand %p1306_p6, %p1300_p12 }
  0xc0   : > { %1002 = vmatprep.subr.bf16.mxu1 %v1386_v0  ;;  %v1024_v32 = vpack.c.bf16 %v600_v31, %v598_v30  ;;  %v602_v36 = vld [vmem:[#allocation8 + $0x48] sm:$0xff]  ;;  %v604_v37 = vld [vmem:[#allocation8 + $0x58] sm:$0xff]  ;;  %v601_v39 = vld [vmem:[#allocation8 + $0x40] sm:$0xff] }
  0xc1   : > { %983 = vmatpush3.bf16.msra.mxu0 %v982_v13  ;;  %v603_v40 = vld [vmem:[#allocation8 + $0x50] sm:$0xff]  ;;  %v606_v42 = vld [vmem:[#allocation8 + $0x68] sm:$0xff]  ;;  %v608_v43 = vld [vmem:[#allocation8 + $0x78] sm:$0xff] }
  0xc2   : > { %984 = vmatprep.subr.bf16.mxu0 %v1386_v0  ;;  %v605_v45 = vld [vmem:[#allocation8 + $0x60] sm:$0xff]  ;;  %v607_v46 = vld [vmem:[#allocation8 + $0x70] sm:$0xff]  ;;  %v610_v48 = vld [vmem:[#allocation8 + $0x88] sm:$0xff] }
  0xc3   : > { %1004 = vmatpush3.bf16.msra.mxu1 %v1003_v35  ;;  %v1026_v35 = vpack.c.bf16 %v599_v34, %v597_v33  ;;  %v612_v49 = vld [vmem:[#allocation8 + $0x98] sm:$0xff]  ;;  %v609_v51 = vld [vmem:[#allocation8 + $0x80] sm:$0xff]  ;;  %v611_v53 = vld [vmem:[#allocation8 + $0x90] sm:$0xff]  ;;  %v584_v34 = vsub.s32 4, %v1677_v52 }
  0xc4   : > { %1005 = vmatprep.subr.bf16.mxu1 %v1386_v0 }
  0xc5   : > { %986 = vmatpush3.bf16.msra.mxu0 %v985_v16 }
  0xc6   : > { %987 = vmatprep.subr.bf16.mxu0 %v1386_v0 }
  0xc7   : > { %1007 = vmatpush3.bf16.msra.mxu1 %v1006_v38  ;;  %v1028_v38 = vpack.c.bf16 %v604_v37, %v602_v36  ;;  %v585_v37 = vrot.slane %v1683_v54, %v584_v34 }
  0xc8   : > { %1008 = vmatprep.subr.bf16.mxu1 %v1386_v0 }
  0xc9   : > { %989 = vmatpush3.bf16.msra.mxu0 %v988_v19 }
  0xca   : > { %990 = vmatprep.subr.bf16.mxu0 %v1386_v0 }
  0xcb   : > { %1010 = vmatpush3.bf16.msra.mxu1 %v1009_v41  ;;  %v1030_v41 = vpack.c.bf16 %v603_v40, %v601_v39 }
  0xcc   : > { %1011 = vmatprep.subr.bf16.mxu1 %v1386_v0 }
  0xcd   : > { %992 = vmatpush3.bf16.msra.mxu0 %v991_v22 }
  0xce   : > { %993 = vmatprep.subr.bf16.mxu0 %v1386_v0 }
  0xcf   : > { %1013 = vmatpush3.bf16.msra.mxu1 %v1012_v44  ;;  %v1032_v44 = vpack.c.bf16 %v608_v43, %v606_v42 }
  0xd0   : > { %1014 = vmatprep.subr.bf16.mxu1 %v1386_v0 }
  0xd1   : > { %995 = vmatpush3.bf16.msra.mxu0 %v994_v25  ;;  %v596_v25 = vld [vmem:[#allocation8 + $0x18] sm:$0xff] }
  0xd3   : > { %1016 = vmatpush3.bf16.msra.mxu1 %v1015_v47  ;;  %v1034_v47 = vpack.c.bf16 %v607_v46, %v605_v45  ;;  %v703_v45 = vsub.s32 7, %v1677_v52 }
  0xd4   : > { %935 = vmatmul.mubr.f32.vlgmr.msra.gmra.mrb[0].mxu0 %v345_v26  ;;  %1017 = vmatprep.subr.bf16.mxu1 %v1386_v0  ;;  %v1020_v26 = vpack.c.bf16 %v596_v25, %v594_v24 }
  0xd5   : > { %689 = vmatprep.mubr.f32.mxu0 %v1388_v1 }
  0xd6   : > { %1021 = vmatprep.subr.bf16.mxu0 %v1020_v26 }
  0xd7   : > { %1019 = vmatpush3.bf16.msra.mxu1 %v1018_v50  ;;  %1023 = vmatpush1.bf16.msra.mxu0 %v1022_v29  ;;  %v1036_v50 = vpack.c.bf16 %v612_v49, %v610_v48 }
  0xd8   : > { %1025 = vmatprep.subr.bf16.mxu0 %v1024_v32 }
  0xdb   : > { %1027 = vmatpush1.bf16.msra.mxu0 %v1026_v35  ;;  %v589_v35 = vsub.s32 5, %v1677_v52 }
  0xdc   : > { %1029 = vmatprep.subr.bf16.mxu0 %v1028_v38 }
  0xdd   : > { %v590_v40 = vrot.slane %v1683_v54, %v589_v35 }
  0xdf   : > { %1031 = vmatpush1.bf16.msra.mxu0 %v1030_v41 }
  0xe0   : > { %1033 = vmatprep.subr.bf16.mxu0 %v1032_v44  ;;  %v698_v44 = vsub.s32 6, %v1677_v52 }
  0xe2   : > { %v699_v46 = vrot.slane %v1683_v54, %v698_v44 }
  0xe3   : > { %1035 = vmatpush1.bf16.msra.mxu0 %v1034_v47  ;;  %v704_v47 = vrot.slane %v1683_v54, %v703_v45 }
  0xe4   : > { %1037 = vmatprep.subr.bf16.mxu0 %v1036_v50 }
 0x1a7   : > { %v433_v56 = vpop.f32.mrb[0].mxu0 }
 0x1a8   : > { %v434_v57 = vadd.f32 %v433_v56, %v366_v55  ;;  %v936_v58 = vpop.f32.mrb[1].mxu0  ;;  %v1038_v55 = vpack.c.bf16 %v611_v53, %v609_v51  ;;  %v614_v56 = vld [vmem:[#allocation8 + $0xa8] sm:$0xff] }
 0x1aa   : > { %v437_v59 = vrot.slane %v434_v57, 4  ;;  %v444_v60 = vmul.f32 %v434_v57, %v434_v57  ;;  %1039 = vmatpush1.bf16.msra.mxu0 %v1038_v55 }
 0x1ac   : > { %v438_v61 = vadd.f32 %v437_v59, %v434_v57  ;;  %v445_v62 = vrot.slane %v444_v60, 4  ;;  %v613_v59 = vld [vmem:[#allocation8 + $0xa0] sm:$0xff] }
 0x1ae   : > { %v439_v63 = vrot.slane %v438_v61, 2  ;;  %v446_v0 = vadd.f32 %v445_v62, %v444_v60  ;;  %v615_v60 = vld [vmem:[#allocation8 + $0xb0] sm:$0xff]  ;;  %v618_v62 = vld [vmem:[#allocation8 + $0xc8] sm:$0xff] }
 0x1b0   : > { %v440_v1 = vadd.f32 %v439_v63, %v438_v61  ;;  %v447_v2 = vrot.slane %v446_v0, 2  ;;  %v1042_v61 = vpack.c.bf16 %v615_v60, %v613_v59  ;;  %v620_v63 = vld [vmem:[#allocation8 + $0xd8] sm:$0xff] }
 0x1b2   : > { %v441_v3 = vrot.slane %v440_v1, 1  ;;  %v448_v4 = vadd.f32 %v447_v2, %v446_v0  ;;  %v617_v0 = vld [vmem:[#allocation8 + $0xc0] sm:$0xff]  ;;  %v619_v2 = vld [vmem:[#allocation8 + $0xd0] sm:$0xff] }
 0x1b4   : > { %v442_v5 = vadd.f32 %v441_v3, %v440_v1  ;;  %v449_v6 = vrot.slane %v448_v4, 1  ;;  %v1044_v1 = vpack.c.bf16 %v620_v63, %v618_v62  ;;  %v622_v3 = vld [vmem:[#allocation8 + $0xe8] sm:$0xff] }
 0x1b6   : > { %v443_v7 = vmul.f32 0.125, %v442_v5  ;;  %v450_v8 = vadd.f32 %v449_v6, %v448_v4  ;;  %v624_v4 = vld [vmem:[#allocation8 + $0xf8] sm:$0xff]  ;;  %v1046_v5 = vpack.c.bf16 %v619_v2, %v617_v0 }
 0x1b7   : > { %v1048_v6 = vpack.c.bf16 %v624_v4, %v622_v3 }
 0x1b8   : > { %v451_v9 = vmul.f32 0.125, %v450_v8  ;;  %v452_v10 = vmul.f32 %v443_v7, %v443_v7  ;;  %v455_v16 = vsub.f32 %v434_v57, %v443_v7  ;;  %v616_v57 = vld [vmem:[#allocation8 + $0xb8] sm:$0xff]  ;;  %v621_v7 = vld [vmem:[#allocation8 + $0xe0] sm:$0xff]  ;;  %v623_v8 = vld [vmem:[#allocation8 + $0xf0] sm:$0xff] }
 0x1b9   : > { %v1040_v58 = vpack.c.bf16 %v616_v57, %v614_v56  ;;  %v709_v56 = vld [vmem:[%s1654_s29] sm:$0xff] }
 0x1ba   : > { %v453_v11 = vsub.f32 %v451_v9, %v452_v10  ;;  %v1050_v9 = vpack.c.bf16 %v623_v8, %v621_v7  ;;  %v488_v10 = vsub.s32 3, %v1677_v52 }
 0x1bb   : > { %1041 = vmatprep.subr.bf16.mxu0 %v1040_v58 }
 0x1bc   : > { %v454_v12 = vmax.f32 %v453_v11, 0.0  ;;  %1043 = vmatpush1.bf16.msra.mxu0 %v1042_v61  ;;  %v489_v11 = vrot.slane %v1683_v54, %v488_v10 }
 0x1bd   : > { %1045 = vmatprep.subr.bf16.mxu0 %v1044_v1 }
 0x1be   : > { %v456_v13 = vadd.f32 1e-05, %v454_v12 }
 0x1c0   : > { %1143 = vrsqrt.f32 %v456_v13  ;;  %1047 = vmatpush1.bf16.msra.mxu0 %v1046_v5 }
 0x1c1   : > { %1049 = vmatprep.subr.bf16.mxu0 %v1048_v6 }
 0x1c4   : > { %1051 = vmatpush1.bf16.msra.mxu0 %v1050_v9 }
 0x1ca   : > { %v1144_v18 = vpop.eup %1143 }
 0x1cb   : > { %v458_v19 = vmul.f32 %v1144_v18, %v455_v16 }
 0x1cd   : > { %v463_v21 = vmul.f32 %v462_v17, %v458_v19 }
 0x1cf   : > { %v468_v22 = vadd.f32 %v467_v20, %v463_v21 }
 0x1d1   : > { %1145 = vtanh.f32 %v468_v22 }
 0x1db   : > { %v1146_v23 = vpop.eup %1145 }
 0x1dc   : > { %970 = vmatmul.mubr.f32.vlgmr.msra.gmra.mrb[0].mxu1 %v1146_v23 }
 0x2af   : > { %v556_v12 = vpop.f32.mrb[0].mxu1 }
 0x2b0   : > { %v557_v13 = vadd.f32 %v556_v12, %v489_v11  ;;  %v971_v14 = vpop.f32.mrb[1].mxu1 }
 0x2b2   : > { %v560_v15 = vrot.slane %v557_v13, 4  ;;  %v567_v16 = vmul.f32 %v557_v13, %v557_v13 }
 0x2b4   : > { %v561_v17 = vadd.f32 %v560_v15, %v557_v13  ;;  %v568_v18 = vrot.slane %v567_v16, 4 }
 0x2b6   : > { %v562_v19 = vrot.slane %v561_v17, 2  ;;  %v569_v20 = vadd.f32 %v568_v18, %v567_v16 }
 0x2b8   : > { %v563_v21 = vadd.f32 %v562_v19, %v561_v17  ;;  %v570_v22 = vrot.slane %v569_v20, 2 }
 0x2ba   : > { %v564_v23 = vrot.slane %v563_v21, 1  ;;  %v571_v24 = vadd.f32 %v570_v22, %v569_v20 }
 0x2bc   : > { %v565_v25 = vadd.f32 %v564_v23, %v563_v21  ;;  %v572_v26 = vrot.slane %v571_v24, 1 }
 0x2be   : > { %v566_v27 = vmul.f32 0.125, %v565_v25  ;;  %v573_v28 = vadd.f32 %v572_v26, %v571_v24 }
 0x2c0   : > { %v574_v29 = vmul.f32 0.125, %v573_v28  ;;  %v575_v30 = vmul.f32 %v566_v27, %v566_v27  ;;  %v578_v36 = vsub.f32 %v557_v13, %v566_v27 }
 0x2c2   : > { %v576_v31 = vsub.f32 %v574_v29, %v575_v30 }
 0x2c4   : > { %v577_v32 = vmax.f32 %v576_v31, 0.0 }
 0x2c6   : > { %v579_v33 = vadd.f32 1e-05, %v577_v32 }
 0x2c8   : > { %1147 = vrsqrt.f32 %v579_v33 }
 0x2d2   : > { %v1148_v38 = vpop.eup %1147 }
 0x2d3   : > { %v581_v39 = vmul.f32 %v1148_v38, %v578_v36 }
 0x2d5   : > { %v586_v41 = vmul.f32 %v585_v37, %v581_v39 }
 0x2d7   : > { %v591_v42 = vadd.f32 %v590_v40, %v586_v41 }
 0x2d9   : > { %1149 = vtanh.f32 %v591_v42 }
 0x2e3   : > { %v1150_v43 = vpop.eup %1149 }
 0x2e4   : > { %690 = vmatmul.mubr.f32.vlgmr.msra.gmra.mrb[2].mxu0 %v1150_v43 }
 0x3b7   : > { %v691_v48 = vpop.f32.mrb[2].mxu0 }
 0x3b8   : > { %v700_v49 = vadd.f32 %v699_v46, %v691_v48  ;;  %v693_v50 = vpop.f32.mrb[3].mxu0 }
 0x3b9   : > { %v705_v51 = vadd.f32 %v704_v47, %v693_v50 }
 0x3ba   : > { %713 = vst [vmem:[%s344_s7 + $0x8] sm:$0xff] %v700_v49 }
 0x3bb   : > { %v706_v53 = vmul.f32 0.5, %v705_v51  ;;  %714 = vst [vmem:[%s344_s7 + $0x10] sm:$0xff] %v705_v51 }
 0x3bd   : > { %v707_v55 = vmul.f32 1.442695, %v706_v53 }
 0x3bf   : > { %1151 = vpow2.f32 %v707_v55 }
 0x3c9   : > { %v1152_v52 = vpop.eup %1151 }
 0x3ca   : > { %v710_v57 = vmul.f32 %v1152_v52, %v709_v56 }
 0x3cc   : > { %v711_v58 = vadd.f32 %v710_v57, %v700_v49 }
 0x3ce   : > { %712 = vst [vmem:[%s344_s7] sm:$0xff] %v711_v58 }
 0x3cf   : > { %1310 = shalt.err (!%p1307_p8)
}
 0x3d0   : > { %s1311_s8 = scalar_lea.hbm %s1706_s1, 384  ;;  %s1315_s16 = scalar_lea.hbm %s1755_s6, 1536 }
 0x3d1   : > { %p1312_p0 = scmp.ne.s32.totalorder %s1706_s1, %s1311_s8  ;;  %p1316_p3 = scmp.lt.u32.totalorder %s1706_s1, %s1755_s6 }
 0x3d2   : > { %p1317_p7 = scmp.lt.u32.totalorder %s1315_s16, %s1311_s8  ;;  %p1319_p1 = scmp.lt.u32.totalorder %s1311_s8, %s1706_s1 }
 0x3d3   : > { %p1313_p11 = pnand %p1312_p0, %p1803_p2 }
 0x3d4   : > { %p1318_p10 = por %p1317_p7, %p1316_p3 }
 0x3d5   : > { %p1314_p5 = pneg %p1313_p11 }
 0x3d6   : > { %p1320_p4 = por %p1319_p1, %p1318_p10 }
 0x3d8   : > { %p1321_p12 = pnand %p1320_p4, %p1314_p5 }
 0x3da   : > { %1324 = shalt.err (!%p1321_p12)
}
 0x3db   : > { %1070 = dma.vmem_to_hbm [thread:$0]  (%p1803_p2), %s1708_s24, 384, %s1706_s1, %s716_s0  }
 0x3dc PF: > { %s1804_s23 = sld [smem:[#allocation19_spill]]  ;;  %s1805_s19 = sld [smem:[#allocation17_spill]] }
 0x3dd   : > { %s1806_s21 = sld [smem:[#allocation20_spill]] }
 0x3e2   : > { %p1100_p13 = scmp.ge.s32.totalorder %s1804_s23, 2  ;;  %s742_s29 = sand.u32 1, %s1805_s19  }
 0x3e3   : > { %p1807_p9 = scmp.ne.s32.totalorder %s1806_s21, 0  ;;  %s743_s27 = scalar_lea.sflag [#allocation4], %s742_s29 }
 0x3e5   : > { %p1090_p6 = pnand %p1100_p13, %p1807_p9 }
 0x3e7   : > { %1358 = dma.done.wait (!%p1090_p6), %s743_s27, 384  }
 0x3e8   : > { %1360 = vsyncadd (!%p1090_p6), %s743_s27, 4294966912  ;;  %s1808_s24 = sld [smem:[#allocation21_spill]]  ;;  %s1809_s26 = sld [smem:[#allocation18_spill]] }
 0x3e9   : > { %s1810_s23 = sld [smem:[#allocation22_spill]]  ;;  %s1811_s21 = smov %s1367_s22 }
 0x3ee   : > { %p21_p8 = scmp.ge.s32.totalorder %s1808_s24, 6   ;;  %s1812_s22 = smov %s1809_s26 }
 0x3f0   :  { %23 = sbr.rel (!%p21_p8) target bundleno = 10 (0xa), region = 112 }
 0x3f7   :  { %748 = vsyncpa [#allocation3], 1 }
 0x3f8   :  { %750 = vsyncpa [#allocation3 + $0x1], 1 }
 0x3f9   :  { %751 = vsyncpa [#allocation6], 1 }
 0x3fa   :  { %752 = vsyncpa [#allocation9], 1 }
 0x3fb   :  { %753 = vsyncpa [#allocation4], 1 }
 0x3fc   :  { %755 = vsyncpa [#allocation4 + $0x1], 1 }

</bundles_post_ra>
